<compile_context>
chip_gen: v7x
topology: tpu7x:2x2x1
jax: 0.10.0
libtpu: 0.0.40
codegen_flags: <defaults>
</compile_context>

<pallas_src>
import functools

import jax
import jax.numpy as jnp
from jax import lax
from jax.experimental import pallas as pl
from jax.experimental.pallas import tpu as pltpu

LN_EPS = 1e-5
CLAMP_LO, CLAMP_HI = -5.0, 5.0
LANE = 128


def _round_up(x, m):
    return (x + m - 1) // m * m


def _layer_norm(h, gamma, beta):
    mu = jnp.mean(h, axis=-1, keepdims=True)
    var = jnp.mean((h - mu) * (h - mu), axis=-1, keepdims=True)
    return (h - mu) * lax.rsqrt(var + LN_EPS) * gamma + beta


def _pack_vectors(named):
    """Concatenate (1, w) vectors into one (1, sum(round_up(w,128))) array.

    Each segment starts at a 128-lane-aligned offset so the static in-kernel
    slice is a plain aligned (masked) vector load with no lane rotation.
    Returns (packed_array, {name: (offset, width)}).
    """
    offs = {}
    cols = []
    off = 0
    for name, v in named:
        v = jnp.asarray(v, jnp.float32).reshape(1, -1)
        w = v.shape[1]
        seg = _round_up(w, LANE)
        offs[name] = (off, w)
        cols.append(jnp.pad(v, ((0, 0), (0, seg - w))))
        off += seg
    return jnp.concatenate(cols, axis=1), offs


def critic_kernel(use_c51, layer_norm, seg,
                  ob_ref, ac_ref, vec_ref,
                  w1a_ref, w1b_ref, w2_ref, wh_ref,
                  out_ref):
    def vec(name):
        off, width = seg[name]
        return vec_ref[:, off:off + width]

    # --- observation standardization folded to mul-add + clamp (VPU) ---
    ob = jnp.clip(ob_ref[...] * vec("scale") - vec("shift"), CLAMP_LO, CLAMP_HI)

    # --- fc_block_1: split matmul (ob @ w1a + ac @ w1b), no lane concat ---
    h = (jnp.dot(ob, w1a_ref[...], preferred_element_type=jnp.float32)
         + jnp.dot(ac_ref[...], w1b_ref[...], preferred_element_type=jnp.float32)
         + vec("b1"))
    if layer_norm:
        h = _layer_norm(h, vec("g1"), vec("be1"))
    h = jnp.maximum(h, 0.0)

    # --- fc_block_2 ---
    h = jnp.dot(h, w2_ref[...], preferred_element_type=jnp.float32) + vec("b2")
    if layer_norm:
        h = _layer_norm(h, vec("g2"), vec("be2"))
    h = jnp.maximum(h, 0.0)

    # --- head at its true width (no lane padding, no atom mask needed) ---
    logits = (jnp.dot(h, wh_ref[...], preferred_element_type=jnp.float32)
              + vec("bh"))

    if use_c51:
        m = jnp.max(logits, axis=-1, keepdims=True)
        e = jnp.exp(logits - m)
        s = jnp.sum(e, axis=-1, keepdims=True)
        # approx=True would move the divide to the EUP slot; kept exact here to
        # hold the 1e-4 reference tolerance without hardware validation.
        out_ref[...] = e * pl.reciprocal(s, approx=False)
    else:
        out_ref[...] = logits


def critic_forward(ob, ac, params, *, use_c51, layer_norm, block_batch=1024):
    batch, ob_dim = ob.shape
    ac_dim = ac.shape[1]
    num_heads = params["wh"].shape[1]

    # --- fold standardization: (ob - mean)/std == ob*(1/std) - mean*(1/std) ---
    inv_std = 1.0 / params["rms_std"]
    shift = params["rms_mean"] * inv_std

    # --- split first-layer weight so the kernel never concatenates ob||ac ---
    w1a = params["w1"][:ob_dim]      # (ob_dim, h0)
    w1b = params["w1"][ob_dim:]      # (ac_dim, h0)

    # --- pack all small (1, h) vectors into one lane-aligned slab ---
    vecs, seg = _pack_vectors([
        ("scale", inv_std), ("shift", shift),
        ("b1", params["b1"]), ("g1", params["g1"]), ("be1", params["be1"]),
        ("b2", params["b2"]), ("g2", params["g2"]), ("be2", params["be2"]),
        ("bh", params["bh"]),
    ])

    # --- batch tiling: no padding of inputs/outputs.
    #     * b_t is a multiple of 8 (or equals the full batch for tiny inputs),
    #     * capped so large batches give >=4 grid steps (v7x megacore),
    #     * floored at 128 rows to amortize per-step overhead,
    #     * ragged last tile relies on Pallas boundary masking (row-local math).
    b_t = _round_up(block_batch, 8)
    b_t = min(b_t, max(_round_up(pl.cdiv(batch, 4), 8), 128))
    if b_t >= batch:
        b_t = batch
    grid = (pl.cdiv(batch, b_t),)

    def rowtile(c):
        return pl.BlockSpec((b_t, c), lambda i: (i, 0))

    def const(arr):
        return pl.BlockSpec(arr.shape, lambda i: (0, 0))

    kernel = functools.partial(critic_kernel, use_c51, layer_norm, seg)
    out = pl.pallas_call(
        kernel,
        out_shape=jax.ShapeDtypeStruct((batch, num_heads), jnp.float32),
        grid=grid,
        in_specs=[rowtile(ob_dim), rowtile(ac_dim), const(vecs),
                  const(w1a), const(w1b),
                  const(params["w2"]), const(params["wh"])],
        out_specs=pl.BlockSpec((b_t, num_heads), lambda i: (i, 0)),
        compiler_params=pltpu.CompilerParams(
            dimension_semantics=("parallel",)),
    )(ob, ac, vecs, w1a, w1b, params["w2"], params["wh"])
    return out


def _orthogonal(key, n_in, n_out):
    """Deterministic orthogonal init (matches nn.init.orthogonal_ semantics)."""
    rows, cols = max(n_in, n_out), min(n_in, n_out)
    a = jax.random.normal(key, (rows, cols), dtype=jnp.float32)
    q, r = jnp.linalg.qr(a)
    q = q * jnp.sign(jnp.diag(r))[None, :]
    if n_in >= n_out:
        return q                      # (n_in, n_out)
    return q.T                        # (n_in, n_out)


def make_params(key, ob_dim, ac_dim, hid_dims, num_heads):
    k = jax.random.split(key, 5)
    h0, h1 = hid_dims
    return {
        # running-moments statistics (synthetic, deterministic)
        # TODO(synk): RunningMoments statistics *updates* are training-time
        # bookkeeping; only standardize() appears in forward, so stats are
        # passed in as constants.
        "rms_mean": jax.random.normal(k[0], (1, ob_dim), jnp.float32) * 0.1,
        "rms_std": jnp.abs(jax.random.normal(k[1], (1, ob_dim), jnp.float32)) + 0.5,
        # fc_block_1  (weights stored (in, out), i.e. transposed vs PyTorch)
        "w1": _orthogonal(k[2], ob_dim + ac_dim, h0),
        "b1": jnp.zeros((1, h0), jnp.float32),
        "g1": jnp.ones((1, h0), jnp.float32),
        "be1": jnp.zeros((1, h0), jnp.float32),
        # fc_block_2
        "w2": _orthogonal(k[3], h0, h1),
        "b2": jnp.zeros((1, h1), jnp.float32),
        "g2": jnp.ones((1, h1), jnp.float32),
        "be2": jnp.zeros((1, h1), jnp.float32),
        # head
        "wh": _orthogonal(k[4], h1, num_heads),
        "bh": jnp.zeros((1, num_heads), jnp.float32),
    }


def reference_forward(ob, ac, p, *, use_c51, layer_norm):
    """Pure-JAX reference for validation."""
    obn = jnp.clip((ob - p["rms_mean"]) / p["rms_std"], CLAMP_LO, CLAMP_HI)
    x = jnp.concatenate([obn, ac], axis=-1)
    h = x @ p["w1"] + p["b1"]
    if layer_norm:
        h = _layer_norm(h, p["g1"], p["be1"])
    h = jnp.maximum(h, 0.0)
    h = h @ p["w2"] + p["b2"]
    if layer_norm:
        h = _layer_norm(h, p["g2"], p["be2"])
    h = jnp.maximum(h, 0.0)
    logits = h @ p["wh"] + p["bh"]
    if use_c51:
        return jnp.exp(jax.nn.log_softmax(logits, axis=1))
    return logits


if __name__ == "__main__":
    # Configuration consistent with the module:
    #   ob_shape=(16,), ac_shape=(8,), hid_dims=(32, 32),
    #   layer_norm=True, use_c51=True, c51_num_atoms=51
    batch, ob_dim, ac_dim = 8, 16, 8
    hid_dims = (32, 32)
    c51_num_atoms = 51

    key = jax.random.PRNGKey(0)
    kp, ko, ka = jax.random.split(key, 3)

    # --- case 1: C51 head + LayerNorm (single whole-batch tile) ---
    params = make_params(kp, ob_dim, ac_dim, hid_dims, c51_num_atoms)
    ob = jax.random.normal(ko, (batch, ob_dim), jnp.float32)
    ac = jax.random.normal(ka, (batch, ac_dim), jnp.float32)

    out = critic_forward(ob, ac, params, use_c51=True, layer_norm=True)
    out = jax.block_until_ready(out)
    ref = reference_forward(ob, ac, params, use_c51=True, layer_norm=True)
    assert out.shape == (batch, c51_num_atoms)
    assert jnp.allclose(out, ref, atol=1e-4, rtol=1e-4), "c51 mismatch vs reference"

    # --- case 2: scalar head, no LayerNorm; ragged batch exercises the
    #     multi-step grid with a partial (boundary-masked) last tile ---
    batch2 = 20
    params2 = make_params(kp, ob_dim, ac_dim, hid_dims, 1)
    ob2 = jax.random.normal(ko, (batch2, ob_dim), jnp.float32)
    ac2 = jax.random.normal(ka, (batch2, ac_dim), jnp.float32)

    out2 = critic_forward(ob2, ac2, params2, use_c51=False, layer_norm=False,
                          block_batch=8)
    out2 = jax.block_until_ready(out2)
    ref2 = reference_forward(ob2, ac2, params2, use_c51=False, layer_norm=False)
    assert out2.shape == (batch2, 1)
    assert jnp.allclose(out2, ref2, atol=1e-4, rtol=1e-4), "scalar mismatch vs reference"

    print("KERNEL_OK")
</pallas_src>

<mosaic_0001>
module attributes {stable_mosaic.version = 11 : i64} {
  func.func @critic_kernel(%arg0: i32, %arg1: memref<8x16xf32, #tpu.memory_space<vmem>>, %arg2: memref<8x8xf32, #tpu.memory_space<vmem>>, %arg3: memref<1x1152xf32, #tpu.memory_space<vmem>>, %arg4: memref<16x32xf32, #tpu.memory_space<vmem>>, %arg5: memref<8x32xf32, #tpu.memory_space<vmem>>, %arg6: memref<32x32xf32, #tpu.memory_space<vmem>>, %arg7: memref<32x51xf32, #tpu.memory_space<vmem>>, %arg8: memref<8x51xf32, #tpu.memory_space<vmem>>) attributes {dimension_semantics = [#tpu.dimension_semantics<parallel>], iteration_bounds = array<i64: 1>, scalar_prefetch = 0 : i64, scratch_operands = 0 : i64, tpu.core_type = #tpu.core_type<tc>, window_params = [{transform_indices = @transform_0, window_bounds = array<i64: 8, 16>}, {transform_indices = @transform_1, window_bounds = array<i64: 8, 8>}, {pipeline_mode = #tpu.pipeline_mode<synchronous>, transform_indices = @transform_2, window_bounds = array<i64: 1, 1152>}, {pipeline_mode = #tpu.pipeline_mode<synchronous>, transform_indices = @transform_3, window_bounds = array<i64: 16, 32>}, {pipeline_mode = #tpu.pipeline_mode<synchronous>, transform_indices = @transform_4, window_bounds = array<i64: 8, 32>}, {pipeline_mode = #tpu.pipeline_mode<synchronous>, transform_indices = @transform_5, window_bounds = array<i64: 32, 32>}, {pipeline_mode = #tpu.pipeline_mode<synchronous>, transform_indices = @transform_6, window_bounds = array<i64: 32, 51>}, {transform_indices = @transform_7, window_bounds = array<i64: 8, 51>}]} {
    %c0 = arith.constant 0 : index
    %c0_0 = arith.constant 0 : index
    %0 = vector.load %arg1[%c0, %c0_0] : memref<8x16xf32, #tpu.memory_space<vmem>>, vector<8x16xf32>
    %c0_1 = arith.constant 0 : index
    %c0_2 = arith.constant 0 : index
    %1 = vector.load %arg3[%c0_1, %c0_2] : memref<1x1152xf32, #tpu.memory_space<vmem>>, vector<1x16xf32>
    %2 = vector.broadcast %1 : vector<1x16xf32> to vector<8x16xf32>
    %3 = arith.mulf %0, %2 : vector<8x16xf32>
    %c0_3 = arith.constant 0 : index
    %c128 = arith.constant 128 : index
    %4 = vector.load %arg3[%c0_3, %c128] : memref<1x1152xf32, #tpu.memory_space<vmem>>, vector<1x16xf32>
    %5 = vector.broadcast %4 : vector<1x16xf32> to vector<8x16xf32>
    %6 = arith.subf %3, %5 : vector<8x16xf32>
    %cst = arith.constant -5.000000e+00 : f32
    %cst_4 = arith.constant 5.000000e+00 : f32
    %7 = vector.broadcast %cst : f32 to vector<8x16xf32>
    %8 = arith.maximumf %7, %6 : vector<8x16xf32>
    %9 = vector.broadcast %cst_4 : f32 to vector<8x16xf32>
    %10 = arith.minimumf %9, %8 : vector<8x16xf32>
    %c0_5 = arith.constant 0 : index
    %c0_6 = arith.constant 0 : index
    %11 = vector.load %arg4[%c0_5, %c0_6] : memref<16x32xf32, #tpu.memory_space<vmem>>, vector<16x32xf32>
    %cst_7 = arith.constant dense<0.000000e+00> : vector<8x32xf32>
    %12 = tpu.matmul %10, %11, %cst_7 {dimension_numbers = #tpu.dot_dimension_numbers<[1], [0], [0], [1], [0, 0, 1, 1], [], []>} : vector<8x16xf32>, vector<16x32xf32>, vector<8x32xf32> -> vector<8x32xf32>
    %c0_8 = arith.constant 0 : index
    %c0_9 = arith.constant 0 : index
    %13 = vector.load %arg2[%c0_8, %c0_9] : memref<8x8xf32, #tpu.memory_space<vmem>>, vector<8x8xf32>
    %c0_10 = arith.constant 0 : index
    %c0_11 = arith.constant 0 : index
    %14 = vector.load %arg5[%c0_10, %c0_11] : memref<8x32xf32, #tpu.memory_space<vmem>>, vector<8x32xf32>
    %cst_12 = arith.constant dense<0.000000e+00> : vector<8x32xf32>
    %15 = tpu.matmul %13, %14, %cst_12 {dimension_numbers = #tpu.dot_dimension_numbers<[1], [0], [0], [1], [0, 0, 1, 1], [], []>} : vector<8x8xf32>, vector<8x32xf32>, vector<8x32xf32> -> vector<8x32xf32>
    %16 = arith.addf %12, %15 : vector<8x32xf32>
    %c0_13 = arith.constant 0 : index
    %c256 = arith.constant 256 : index
    %17 = vector.load %arg3[%c0_13, %c256] : memref<1x1152xf32, #tpu.memory_space<vmem>>, vector<1x32xf32>
    %18 = vector.broadcast %17 : vector<1x32xf32> to vector<8x32xf32>
    %19 = arith.addf %16, %18 : vector<8x32xf32>
    %c0_14 = arith.constant 0 : index
    %c384 = arith.constant 384 : index
    %20 = vector.load %arg3[%c0_14, %c384] : memref<1x1152xf32, #tpu.memory_space<vmem>>, vector<1x32xf32>
    %c0_15 = arith.constant 0 : index
    %c512 = arith.constant 512 : index
    %21 = vector.load %arg3[%c0_15, %c512] : memref<1x1152xf32, #tpu.memory_space<vmem>>, vector<1x32xf32>
    %cst_16 = arith.constant dense<0.000000e+00> : vector<8xf32>
    %22 = vector.multi_reduction <add>, %19, %cst_16 [1] : vector<8x32xf32> to vector<8xf32>
    %23 = vector.shape_cast %22 : vector<8xf32> to vector<8x1xf32>
    %cst_17 = arith.constant 3.200000e+01 : f32
    %24 = vector.broadcast %cst_17 : f32 to vector<8x1xf32>
    %25 = arith.divf %23, %24 : vector<8x1xf32>
    %26 = vector.broadcast %25 : vector<8x1xf32> to vector<8x32xf32>
    %27 = arith.subf %19, %26 : vector<8x32xf32>
    %28 = vector.broadcast %25 : vector<8x1xf32> to vector<8x32xf32>
    %29 = arith.subf %19, %28 : vector<8x32xf32>
    %30 = arith.mulf %27, %29 : vector<8x32xf32>
    %cst_18 = arith.constant dense<0.000000e+00> : vector<8xf32>
    %31 = vector.multi_reduction <add>, %30, %cst_18 [1] : vector<8x32xf32> to vector<8xf32>
    %32 = vector.shape_cast %31 : vector<8xf32> to vector<8x1xf32>
    %cst_19 = arith.constant 3.200000e+01 : f32
    %33 = vector.broadcast %cst_19 : f32 to vector<8x1xf32>
    %34 = arith.divf %32, %33 : vector<8x1xf32>
    %35 = vector.broadcast %25 : vector<8x1xf32> to vector<8x32xf32>
    %36 = arith.subf %19, %35 : vector<8x32xf32>
    %cst_20 = arith.constant 9.99999974E-6 : f32
    %37 = vector.broadcast %cst_20 : f32 to vector<8x1xf32>
    %38 = arith.addf %34, %37 : vector<8x1xf32>
    %39 = math.rsqrt %38 : vector<8x1xf32>
    %40 = vector.broadcast %39 : vector<8x1xf32> to vector<8x32xf32>
    %41 = arith.mulf %36, %40 : vector<8x32xf32>
    %42 = vector.broadcast %20 : vector<1x32xf32> to vector<8x32xf32>
    %43 = arith.mulf %41, %42 : vector<8x32xf32>
    %44 = vector.broadcast %21 : vector<1x32xf32> to vector<8x32xf32>
    %45 = arith.addf %43, %44 : vector<8x32xf32>
    %cst_21 = arith.constant 0.000000e+00 : f32
    %46 = vector.broadcast %cst_21 : f32 to vector<8x32xf32>
    %47 = arith.maximumf %45, %46 : vector<8x32xf32>
    %c0_22 = arith.constant 0 : index
    %c0_23 = arith.constant 0 : index
    %48 = vector.load %arg6[%c0_22, %c0_23] : memref<32x32xf32, #tpu.memory_space<vmem>>, vector<32x32xf32>
    %cst_24 = arith.constant dense<0.000000e+00> : vector<8x32xf32>
    %49 = tpu.matmul %47, %48, %cst_24 {dimension_numbers = #tpu.dot_dimension_numbers<[1], [0], [0], [1], [0, 0, 1, 1], [], []>} : vector<8x32xf32>, vector<32x32xf32>, vector<8x32xf32> -> vector<8x32xf32>
    %c0_25 = arith.constant 0 : index
    %c640 = arith.constant 640 : index
    %50 = vector.load %arg3[%c0_25, %c640] : memref<1x1152xf32, #tpu.memory_space<vmem>>, vector<1x32xf32>
    %51 = vector.broadcast %50 : vector<1x32xf32> to vector<8x32xf32>
    %52 = arith.addf %49, %51 : vector<8x32xf32>
    %c0_26 = arith.constant 0 : index
    %c768 = arith.constant 768 : index
    %53 = vector.load %arg3[%c0_26, %c768] : memref<1x1152xf32, #tpu.memory_space<vmem>>, vector<1x32xf32>
    %c0_27 = arith.constant 0 : index
    %c896 = arith.constant 896 : index
    %54 = vector.load %arg3[%c0_27, %c896] : memref<1x1152xf32, #tpu.memory_space<vmem>>, vector<1x32xf32>
    %cst_28 = arith.constant dense<0.000000e+00> : vector<8xf32>
    %55 = vector.multi_reduction <add>, %52, %cst_28 [1] : vector<8x32xf32> to vector<8xf32>
    %56 = vector.shape_cast %55 : vector<8xf32> to vector<8x1xf32>
    %cst_29 = arith.constant 3.200000e+01 : f32
    %57 = vector.broadcast %cst_29 : f32 to vector<8x1xf32>
    %58 = arith.divf %56, %57 : vector<8x1xf32>
    %59 = vector.broadcast %58 : vector<8x1xf32> to vector<8x32xf32>
    %60 = arith.subf %52, %59 : vector<8x32xf32>
    %61 = vector.broadcast %58 : vector<8x1xf32> to vector<8x32xf32>
    %62 = arith.subf %52, %61 : vector<8x32xf32>
    %63 = arith.mulf %60, %62 : vector<8x32xf32>
    %cst_30 = arith.constant dense<0.000000e+00> : vector<8xf32>
    %64 = vector.multi_reduction <add>, %63, %cst_30 [1] : vector<8x32xf32> to vector<8xf32>
    %65 = vector.shape_cast %64 : vector<8xf32> to vector<8x1xf32>
    %cst_31 = arith.constant 3.200000e+01 : f32
    %66 = vector.broadcast %cst_31 : f32 to vector<8x1xf32>
    %67 = arith.divf %65, %66 : vector<8x1xf32>
    %68 = vector.broadcast %58 : vector<8x1xf32> to vector<8x32xf32>
    %69 = arith.subf %52, %68 : vector<8x32xf32>
    %cst_32 = arith.constant 9.99999974E-6 : f32
    %70 = vector.broadcast %cst_32 : f32 to vector<8x1xf32>
    %71 = arith.addf %67, %70 : vector<8x1xf32>
    %72 = math.rsqrt %71 : vector<8x1xf32>
    %73 = vector.broadcast %72 : vector<8x1xf32> to vector<8x32xf32>
    %74 = arith.mulf %69, %73 : vector<8x32xf32>
    %75 = vector.broadcast %53 : vector<1x32xf32> to vector<8x32xf32>
    %76 = arith.mulf %74, %75 : vector<8x32xf32>
    %77 = vector.broadcast %54 : vector<1x32xf32> to vector<8x32xf32>
    %78 = arith.addf %76, %77 : vector<8x32xf32>
    %cst_33 = arith.constant 0.000000e+00 : f32
    %79 = vector.broadcast %cst_33 : f32 to vector<8x32xf32>
    %80 = arith.maximumf %78, %79 : vector<8x32xf32>
    %c0_34 = arith.constant 0 : index
    %c0_35 = arith.constant 0 : index
    %81 = vector.load %arg7[%c0_34, %c0_35] : memref<32x51xf32, #tpu.memory_space<vmem>>, vector<32x51xf32>
    %cst_36 = arith.constant dense<0.000000e+00> : vector<8x51xf32>
    %82 = tpu.matmul %80, %81, %cst_36 {dimension_numbers = #tpu.dot_dimension_numbers<[1], [0], [0], [1], [0, 0, 1, 1], [], []>} : vector<8x32xf32>, vector<32x51xf32>, vector<8x51xf32> -> vector<8x51xf32>
    %c0_37 = arith.constant 0 : index
    %c1024 = arith.constant 1024 : index
    %83 = vector.load %arg3[%c0_37, %c1024] : memref<1x1152xf32, #tpu.memory_space<vmem>>, vector<1x51xf32>
    %84 = vector.broadcast %83 : vector<1x51xf32> to vector<8x51xf32>
    %85 = arith.addf %82, %84 : vector<8x51xf32>
    %cst_38 = arith.constant dense<0xFF800000> : vector<8xf32>
    %86 = vector.multi_reduction <maximumf>, %85, %cst_38 [1] : vector<8x51xf32> to vector<8xf32>
    %87 = vector.shape_cast %86 : vector<8xf32> to vector<8x1xf32>
    %88 = vector.broadcast %87 : vector<8x1xf32> to vector<8x51xf32>
    %89 = arith.subf %85, %88 : vector<8x51xf32>
    %90 = math.exp %89 : vector<8x51xf32>
    %cst_39 = arith.constant dense<0.000000e+00> : vector<8xf32>
    %91 = vector.multi_reduction <add>, %90, %cst_39 [1] : vector<8x51xf32> to vector<8xf32>
    %92 = vector.shape_cast %91 : vector<8xf32> to vector<8x1xf32>
    %93 = tpu.reciprocal %92 : vector<8x1xf32> -> vector<8x1xf32>
    %94 = vector.broadcast %93 : vector<8x1xf32> to vector<8x51xf32>
    %95 = arith.mulf %90, %94 : vector<8x51xf32>
    %c0_40 = arith.constant 0 : index
    %c0_41 = arith.constant 0 : index
    %96 = vector.load %arg8[%c0_40, %c0_41] : memref<8x51xf32, #tpu.memory_space<vmem>>, vector<8x51xf32>
    tpu.vector_store %arg8[%c0_40, %c0_41], %95 {strides = array<i32>} : memref<8x51xf32, #tpu.memory_space<vmem>>, vector<8x51xf32>,
    return
  }
  func.func @transform_0(%arg0: i32) -> (i32, i32) {
    %c0_i32 = arith.constant 0 : i32
    %c0_i32_0 = arith.constant 0 : i32
    return %arg0, %c0_i32 : i32, i32
  }
  func.func @transform_1(%arg0: i32) -> (i32, i32) {
    %c0_i32 = arith.constant 0 : i32
    %c0_i32_0 = arith.constant 0 : i32
    return %arg0, %c0_i32 : i32, i32
  }
  func.func @transform_2(%arg0: i32) -> (i32, i32) {
    %c0_i32 = arith.constant 0 : i32
    %c0_i32_0 = arith.constant 0 : i32
    %c0_i32_1 = arith.constant 0 : i32
    return %c0_i32, %c0_i32_0 : i32, i32
  }
  func.func @transform_3(%arg0: i32) -> (i32, i32) {
    %c0_i32 = arith.constant 0 : i32
    %c0_i32_0 = arith.constant 0 : i32
    %c0_i32_1 = arith.constant 0 : i32
    return %c0_i32, %c0_i32_0 : i32, i32
  }
  func.func @transform_4(%arg0: i32) -> (i32, i32) {
    %c0_i32 = arith.constant 0 : i32
    %c0_i32_0 = arith.constant 0 : i32
    %c0_i32_1 = arith.constant 0 : i32
    return %c0_i32, %c0_i32_0 : i32, i32
  }
  func.func @transform_5(%arg0: i32) -> (i32, i32) {
    %c0_i32 = arith.constant 0 : i32
    %c0_i32_0 = arith.constant 0 : i32
    %c0_i32_1 = arith.constant 0 : i32
    return %c0_i32, %c0_i32_0 : i32, i32
  }
  func.func @transform_6(%arg0: i32) -> (i32, i32) {
    %c0_i32 = arith.constant 0 : i32
    %c0_i32_0 = arith.constant 0 : i32
    %c0_i32_1 = arith.constant 0 : i32
    return %c0_i32, %c0_i32_0 : i32, i32
  }
  func.func @transform_7(%arg0: i32) -> (i32, i32) {
    %c0_i32 = arith.constant 0 : i32
    %c0_i32_0 = arith.constant 0 : i32
    return %arg0, %c0_i32 : i32, i32
  }
}

</mosaic_0001>

<bundles_post_ra>
// kernel: tpu_custom_call.1
= control target key start
LH: loop header
LB: loop body
LE: loop exit
PB: predicated region body
PF: predicated region fallthrough
CT: control target
= control target key end

     0   :  { %12 = vsyncpa [#allocation3], 0  ;;  %s985_s0 = inlined_call_operand.hbm [shape: f32[8,16], index: 0, kind: input, shape index: {}]   ;;  %s986_s1 = inlined_call_operand.hbm [shape: f32[8,8], index: 1, kind: input, shape index: {}]   ;;  %s987_s2 = inlined_call_operand.hbm [shape: f32[1,1152], index: 2, kind: input, shape index: {}]   ;;  %s988_s3 = inlined_call_operand.hbm [shape: f32[16,32], index: 3, kind: input, shape index: {}]   ;;  %s989_s4 = inlined_call_operand.vmem [shape: f32[8,32], index: 4, kind: input, shape index: {}]   ;;  %s990_s5 = inlined_call_operand.hbm [shape: f32[32,32], index: 5, kind: input, shape index: {}]   ;;  %s991_s6 = inlined_call_operand.hbm [shape: f32[32,51], index: 6, kind: input, shape index: {}]   ;;  %s992_s7 = inlined_call_operand.hbm [shape: f32[8,51], index: 7, kind: output, shape index: {}]  }
   0x1   :  { %13 = vsyncpa [#allocation6], 0 }
   0x2   :  { %14 = vsyncpa [#allocation9], 0 }
   0x3   :  { %15 = vsyncpa [#allocation12], 0 }
   0x4   :  { %16 = vsyncpa [#allocation4], 0  ;;  %s805_s24 = smov [#allocation5]   ;;  %s806_s26 = smov [#allocation8]  }
   0x5   :  { %s33_s25 = sshll.u32 %s805_s24, 4  ;;  %s52_s27 = sshll.u32 %s806_s26, 4  ;;  %s34_s25 = int_to_ptr.vmem [resolvable:$true] %s33_s25  ;;  %s857_s27 = int_to_ptr.vmem [resolvable:$true] %s52_s27 }
   0x6   :  { %s641_s30 = scalar_lea.hbm %s986_s1, 128 }
   0x7   :  { %p642_p0 = scmp.ne.s32.totalorder %s986_s1, %s641_s30  ;;  %p645_p1 = scmp.lt.u32.totalorder %s641_s30, %s986_s1 }
   0x9   :  { %p647_p2 = pnand %p645_p1, %p642_p0 }
   0xb   :  { %650 = shalt.err (!%p647_p2)
}
   0xc   :  { %s651_s12 = scalar_lea.vmem %s34_s25, 128  ;;  %p656_p4 = scmp.lt.s32.totalorder %s34_s25, %s34_s25 }
   0xd   :  { %p652_p3 = scmp.ne.s32.totalorder %s34_s25, %s651_s12  ;;  %p657_p5 = scmp.lt.s32.totalorder %s651_s12, %s651_s12 }
   0xf   :  { %p658_p6 = por %p657_p5, %p656_p4 }
  0x11   :  { %p659_p7 = pnand %p658_p6, %p652_p3 }
  0x13   :  { %662 = shalt.err (!%p659_p7)
}
  0x14   :  { %36 = dma.hbm_to_vmem [thread:$0]  %s986_s1, 128, %s34_s25, [#allocation6]  }
  0x15   :  { %s663_s17 = scalar_lea.hbm %s988_s3, 256 }
  0x16   :  { %p664_p8 = scmp.ne.s32.totalorder %s988_s3, %s663_s17  ;;  %p667_p9 = scmp.lt.u32.totalorder %s663_s17, %s988_s3 }
  0x18   :  { %p669_p10 = pnand %p667_p9, %p664_p8 }
  0x1a   :  { %672 = shalt.err (!%p669_p10)
}
  0x1b   :  { %s673_s22 = scalar_lea.vmem %s857_s27, 256  ;;  %p678_p12 = scmp.lt.s32.totalorder %s857_s27, %s857_s27 }
  0x1c   :  { %p674_p11 = scmp.ne.s32.totalorder %s857_s27, %s673_s22  ;;  %p679_p13 = scmp.lt.s32.totalorder %s673_s22, %s673_s22 }
  0x1e   :  { %p680_p0 = por %p679_p13, %p678_p12 }
  0x20   :  { %p681_p1 = pnand %p680_p0, %p674_p11 }
  0x22   :  { %684 = shalt.err (!%p681_p1)
}
  0x23   :  { %s807_s1 = smov 128   ;;  %s808_s23 = smov 8  }
  0x24   :  { %58 = dma.hbm_to_vmem [thread:$0]  %s988_s3, 256, %s857_s27, [#allocation9], %s807_s1, %s807_s1, %s808_s23  }
  0x25   :  { %s809_s26 = smov [#allocation2]   ;;  %s810_s29 = smov [#allocation7]  }
  0x26   :  { %s23_s28 = sshll.u32 %s809_s26, 4  ;;  %s43_s30 = sshll.u32 %s810_s29, 4  ;;  %s24_s28 = int_to_ptr.vmem [resolvable:$true] %s23_s28  ;;  %s44_s30 = int_to_ptr.vmem [resolvable:$true] %s43_s30 }
  0x27   :  { %s685_s10 = scalar_lea.hbm %s985_s0, 128 }
  0x28   :  { %p686_p2 = scmp.ne.s32.totalorder %s985_s0, %s685_s10  ;;  %p689_p3 = scmp.lt.u32.totalorder %s685_s10, %s985_s0 }
  0x2a   :  { %p691_p4 = pnand %p689_p3, %p686_p2 }
  0x2c   :  { %694 = shalt.err (!%p691_p4)
}
  0x2d   :  { %s695_s3 = scalar_lea.vmem %s24_s28, 128  ;;  %p700_p6 = scmp.lt.s32.totalorder %s24_s28, %s24_s28 }
  0x2e   :  { %p696_p5 = scmp.ne.s32.totalorder %s24_s28, %s695_s3  ;;  %p701_p7 = scmp.lt.s32.totalorder %s695_s3, %s695_s3 }
  0x30   :  { %p702_p8 = por %p701_p7, %p700_p6 }
  0x32   :  { %p703_p9 = pnand %p702_p8, %p696_p5 }
  0x34   :  { %706 = shalt.err (!%p703_p9)
}
  0x35   :  { %26 = dma.hbm_to_vmem [thread:$0]  %s985_s0, 128, %s24_s28, [#allocation3]  }
  0x36   :  { %s707_s18 = scalar_lea.hbm %s987_s2, 144 }
  0x37   :  { %p708_p10 = scmp.ne.s32.totalorder %s987_s2, %s707_s18  ;;  %p711_p11 = scmp.lt.u32.totalorder %s707_s18, %s987_s2 }
  0x39   :  { %p713_p12 = pnand %p711_p11, %p708_p10 }
  0x3b   :  { %716 = shalt.err (!%p713_p12)
}
  0x3c   :  { %s717_s24 = scalar_lea.vmem %s44_s30, 144  ;;  %s721_s25 = scalar_lea.vmem %s44_s30, 160 }
  0x3d   :  { %p718_p13 = scmp.ne.s32.totalorder %s44_s30, %s717_s24  ;;  %p722_p0 = scmp.lt.s32.totalorder %s44_s30, %s44_s30 }
  0x3e   :  { %p723_p1 = scmp.lt.s32.totalorder %s721_s25, %s717_s24 }
  0x40   :  { %p724_p2 = por %p723_p1, %p722_p0 }
  0x42   :  { %p725_p3 = pnand %p724_p2, %p718_p13 }
  0x44   :  { %728 = shalt.err (!%p725_p3)
}
  0x45   :  { %46 = dma.hbm_to_vmem [thread:$0]  %s987_s2, 144, %s44_s30, [#allocation6]  }
  0x46   :  { %s811_s28 = smov [#allocation10]   ;;  %s812_s8 = smov [#allocation11]  }
  0x47   :  { %s66_s29 = sshll.u32 %s811_s28, 4  ;;  %s78_s9 = sshll.u32 %s812_s8, 4  ;;  %s67_s29 = int_to_ptr.vmem [resolvable:$true] %s66_s29  ;;  %s915_s9 = int_to_ptr.vmem [resolvable:$true] %s78_s9 }
  0x48   :  { %s729_s12 = scalar_lea.hbm %s990_s5, 512 }
  0x49   :  { %p730_p4 = scmp.ne.s32.totalorder %s990_s5, %s729_s12  ;;  %p733_p5 = scmp.lt.u32.totalorder %s729_s12, %s990_s5 }
  0x4b   :  { %p735_p6 = pnand %p733_p5, %p730_p4 }
  0x4d   :  { %738 = shalt.err (!%p735_p6)
}
  0x4e   :  { %s739_s2 = scalar_lea.vmem %s67_s29, 512  ;;  %p744_p8 = scmp.lt.s32.totalorder %s67_s29, %s67_s29 }
  0x4f   :  { %p740_p7 = scmp.ne.s32.totalorder %s67_s29, %s739_s2  ;;  %p745_p9 = scmp.lt.s32.totalorder %s739_s2, %s739_s2 }
  0x51   :  { %p746_p10 = por %p745_p9, %p744_p8 }
  0x53   :  { %p747_p11 = pnand %p746_p10, %p740_p7 }
  0x55   :  { %750 = shalt.err (!%p747_p11)
}
  0x56   :  { %72 = dma.hbm_to_vmem [thread:$0]  %s990_s5, 512, %s67_s29, [#allocation9], %s807_s1, %s807_s1, %s808_s23  }
  0x57   :  { %s751_s18 = scalar_lea.hbm %s991_s6, 512 }
  0x58   :  { %p752_p12 = scmp.ne.s32.totalorder %s991_s6, %s751_s18  ;;  %p755_p13 = scmp.lt.u32.totalorder %s751_s18, %s991_s6 }
  0x5a   :  { %p757_p0 = pnand %p755_p13, %p752_p12 }
  0x5c   :  { %760 = shalt.err (!%p757_p0)
}
  0x5d   :  { %s761_s24 = scalar_lea.vmem %s915_s9, 512  ;;  %p766_p2 = scmp.lt.s32.totalorder %s915_s9, %s915_s9 }
  0x5e   :  { %p762_p1 = scmp.ne.s32.totalorder %s915_s9, %s761_s24  ;;  %p767_p3 = scmp.lt.s32.totalorder %s761_s24, %s761_s24 }
  0x60   :  { %p768_p4 = por %p767_p3, %p766_p2 }
  0x62   :  { %p769_p5 = pnand %p768_p4, %p762_p1 }
  0x64   :  { %772 = shalt.err (!%p769_p5)
}
  0x65   :  { %84 = dma.hbm_to_vmem [thread:$0]  %s991_s6, 512, %s915_s9, [#allocation12], %s807_s1, %s807_s1, %s808_s23  }
  0x66   :  { %795 = dma.done.wait [#allocation3], 128  }
  0x67   :  { %796 = vsyncadd [#allocation3], 4294967168 }
  0x68   :  { %797 = dma.done.wait [#allocation6], 272  }
  0x69   :  { %798 = vsyncadd [#allocation6], 4294967024 }
  0x6a   :  { %799 = dma.done.wait [#allocation9], 768  }
  0x6b   :  { %800 = vsyncadd [#allocation9], 4294966528 }
  0x6c   :  { %801 = dma.done.wait [#allocation12], 512  }
  0x6d   :  { %802 = vsyncadd [#allocation12], 4294966784  ;;  %v813_v0 = vmov 0.0|0.0   ;;  %v814_v1 = vmov 0.0   ;;  %vm815_vm0 = vmmov 0   ;;  %vm126_vm1 = vcmask 64512  }
  0x6e   :  { %606 = vmatprep.subr.bf16.mxu1 %v813_v0  ;;  %572 = vmatprep.subr.mxu0 %v814_v1  ;;  %v122_v2 = vld [vmem:[#allocation8] sm:$0xff]  ;;  %v123_v3 = vld [vmem:[#allocation8 + $0x8] sm:$0xff]  ;;  %v543_v8 = vld [vmem:[#allocation7] ss:$0 sm:$0xff]  ;;  %vm200_vm2 = vcmask 130048   ;;  %vm284_vm3 = vcmask 261120  }
  0x6f   :  { %574 = vmatprep.mubr.msk.f32.mxu0 %vm815_vm0, %v814_v1  ;;  %581 = vmatprep.mubr.msk.f32.mxu1 %vm815_vm0, %v814_v1  ;;  %v125_v4 = vld [vmem:[%s989_s4] sm:$0xff]  ;;  %v607_v5 = vpack.c.bf16 %v123_v3, %v122_v2  ;;  %v124_v6 = vld [vmem:[#allocation5] sm:$0xff]  ;;  %v544_v10 = vld [vmem:[#allocation7 + $0x1] ss:$0 sm:$0xff]  ;;  %vm512_vm4 = vcmask 416768   ;;  %s816_s4 = smov [#allocation13]  }
  0x70   :  { %573 = vmatpush3.msra.mxu0 %v125_v4  ;;  %v103_v7 = vld [vmem:[#allocation2] sm:$0xff]  ;;  %v548_v16 = vld [vmem:[#allocation7 + $0x2] ss:$0 sm:$0xff]  ;;  %v314_v26 = vld [vmem:[#allocation10] sm:$0xff]  ;;  %s531_s23 = sshll.u32 %s816_s4, 4  ;;  %s532_s23 = int_to_ptr.vmem [resolvable:$true] %s531_s23 }
  0x71   :  { %575 = vmatmul.mubr.msk.f32.vlgmr.msra.gmra.mrb[0].mxu0 %vm126_vm1, %v124_v6  ;;  %v111_v9 = vmul.f32 %v543_v8, %v103_v7  ;;  %609 = vmatprep.subr.bf16.mxu0 %v813_v0  ;;  %v315_v27 = vld [vmem:[#allocation10 + $0x8] sm:$0xff]  ;;  %v316_v29 = vld [vmem:[#allocation10 + $0x10] sm:$0xff]  ;;  %v317_v30 = vld [vmem:[#allocation10 + $0x18] sm:$0xff]  ;;  %s773_s0 = scalar_lea.vmem %s532_s23, 128  ;;  %p778_p7 = scmp.lt.s32.totalorder %s532_s23, %s532_s23 }
  0x72   :  { %608 = vmatpush3.bf16.msra.mxu1 %v607_v5  ;;  %592 = vmatprep.mubr.msk.f32.mxu0 %vm815_vm0, %v814_v1  ;;  %v610_v28 = vpack.c.bf16 %v315_v27, %v314_v26  ;;  %v613_v31 = vpack.c.bf16 %v317_v30, %v316_v29  ;;  %v549_v36 = vld [vmem:[#allocation7 + $0x3] ss:$0 sm:$0xff]  ;;  %v550_v38 = vld [vmem:[#allocation7 + $0x4] ss:$0 sm:$0xff]  ;;  %v551_v42 = vld [vmem:[#allocation7 + $0x5] ss:$0 sm:$0xff]  ;;  %p774_p6 = scmp.ne.s32.totalorder %s532_s23, %s773_s0  ;;  %p779_p8 = scmp.lt.s32.totalorder %s773_s0, %s773_s0 }
  0x73   :  { %v119_v11 = vsub.f32 %v111_v9, %v544_v10  ;;  %615 = vmatprep.subr.bf16.mxu1 %v813_v0  ;;  %v428_v52 = vld [vmem:[#allocation11] sm:$0xff]  ;;  %v429_v53 = vld [vmem:[#allocation11 + $0x8] sm:$0xff]  ;;  %v430_v55 = vld [vmem:[#allocation11 + $0x10] sm:$0xff] }
  0x74   :  { %611 = vmatpush3.bf16.msra.mxu0 %v610_v28  ;;  %v616_v54 = vpack.c.bf16 %v429_v53, %v428_v52  ;;  %v431_v56 = vld [vmem:[#allocation11 + $0x18] sm:$0xff]  ;;  %v553_v62 = vld [vmem:[#allocation7 + $0x6] ss:$0 sm:$0xff]  ;;  %v555_v5 = vld [vmem:[#allocation7 + $0x8] ss:$0 sm:$0xff]  ;;  %p780_p9 = por %p779_p8, %p778_p7 }
  0x75   :  { %v545_v12 = vclamps-f32 %v119_v11, 5.0  ;;  %612 = vmatprep.subr.bf16.mxu0 %v813_v0  ;;  %v619_v57 = vpack.c.bf16 %v431_v56, %v430_v55 }
  0x76   :  { %p781_p10 = pnand %p780_p9, %p774_p6 }
  0x77   :  { %582 = vmatmul.mubr.msk.f32.vlgmr.msra.gmra.mrb[0].mxu1 %vm200_vm2, %v545_v12 }
  0x78   :  { %603 = vmatprep.mubr.msk.f32.mxu1 %vm815_vm0, %v814_v1  ;;  %614 = vmatpush3.bf16.msra.mxu0 %v613_v31  ;;  %v554_v1 = vld [vmem:[#allocation7 + $0x7] ss:$0 sm:$0xff] }
  0x79   :  { %617 = vmatpush3.bf16.msra.mxu1 %v616_v54 }
  0x7a   :  { %618 = vmatprep.subr.bf16.mxu1 %v813_v0 }
  0x7d   :  { %620 = vmatpush3.bf16.msra.mxu1 %v619_v57 }
 0x144   :  { %v196_v13 = vpop.f32.mrb[0].mxu0 }
 0x145   :  { %v576_v14 = vpop.f32.mrb[1].mxu0 }
 0x14a   :  { %v270_v15 = vpop.f32.mrb[0].mxu1 }
 0x14b   :  { %v271_v17 = vadd.f32 %v270_v15, %v196_v13  ;;  %v583_v18 = vpop.f32.mrb[1].mxu1 }
 0x14d   :  { %v281_v19 = vadd.f32 %v548_v16, %v271_v17 }
 0x14f   :  { %v285_v20 = vsel %vm284_vm3, %v281_v19, 0.0 }
 0x150   :  { %286 = vadd.xlane.f32.xlu0 %v285_v20 }
 0x1dd   :  { %v287_v21 = vpop.xlane.xlu0 %286 }
 0x1de   :  { %v289_v22 = vmul.f32 0.03125, %v287_v21 }
 0x1e0   :  { %v290_v23 = vsub.f32 %v281_v19, %v289_v22 }
 0x1e2   :  { %v291_v24 = vmul.f32 %v290_v23, %v290_v23 }
 0x1e4   :  { %v292_v25 = vsel %vm284_vm3, %v291_v24, 0.0 }
 0x1e5   :  { %293 = vadd.xlane.f32.xlu0 %v292_v25 }
 0x272   :  { %v294_v32 = vpop.xlane.xlu0 %293 }
 0x273   :  { %v295_v33 = vmul.f32 0.03125, %v294_v32 }
 0x275   :  { %v296_v34 = vadd.f32 1e-05, %v295_v33 }
 0x277   :  { %633 = vrsqrt.f32 %v296_v34 }
 0x281   :  { %v634_v35 = vpop.eup %633 }
 0x282   :  { %v298_v37 = vmul.f32 %v634_v35, %v290_v23 }
 0x284   :  { %v305_v39 = vmul.f32 %v549_v36, %v298_v37 }
 0x286   :  { %v312_v40 = vadd.f32 %v550_v38, %v305_v39 }
 0x288   :  { %v313_v41 = vmax.f32 %v312_v40, 0.0 }
 0x28a   :  { %593 = vmatmul.mubr.msk.f32.vlgmr.msra.gmra.mrb[2].mxu0 %vm284_vm3, %v313_v41 }
 0x35d   :  { %v394_v43 = vpop.f32.mrb[2].mxu0 }
 0x35e   :  { %v395_v44 = vadd.f32 %v551_v42, %v394_v43  ;;  %v594_v45 = vpop.f32.mrb[3].mxu0 }
 0x360   :  { %v400_v46 = vsel %vm284_vm3, %v395_v44, 0.0 }
 0x361   :  { %401 = vadd.xlane.f32.xlu1 %v400_v46 }
 0x3ee   :  { %v402_v47 = vpop.xlane.xlu1 %401 }
 0x3ef   :  { %v403_v48 = vmul.f32 0.03125, %v402_v47 }
 0x3f1   :  { %v404_v49 = vsub.f32 %v395_v44, %v403_v48 }
 0x3f3   :  { %v405_v50 = vmul.f32 %v404_v49, %v404_v49 }
 0x3f5   :  { %v406_v51 = vsel %vm284_vm3, %v405_v50, 0.0 }
 0x3f6   :  { %407 = vadd.xlane.f32.xlu1 %v406_v51 }
 0x483   :  { %v408_v58 = vpop.xlane.xlu1 %407 }
 0x484   :  { %v409_v59 = vmul.f32 0.03125, %v408_v58 }
 0x486   :  { %v410_v60 = vadd.f32 1e-05, %v409_v59 }
 0x488   :  { %635 = vrsqrt.f32 %v410_v60 }
 0x492   :  { %v636_v61 = vpop.eup %635 }
 0x493   :  { %v412_v63 = vmul.f32 %v636_v61, %v404_v49 }
 0x495   :  { %v419_v2 = vmul.f32 %v553_v62, %v412_v63 }
 0x497   :  { %v426_v3 = vadd.f32 %v554_v1, %v419_v2 }
 0x499   :  { %v427_v4 = vmax.f32 %v426_v3, 0.0 }
 0x49b   :  { %604 = vmatmul.mubr.msk.f32.vlgmr.msra.gmra.mrb[2].mxu1 %vm284_vm3, %v427_v4 }
 0x56e   :  { %v508_v6 = vpop.f32.mrb[2].mxu1 }
 0x56f   :  { %v509_v7 = vadd.f32 %v555_v5, %v508_v6  ;;  %v605_v8 = vpop.f32.mrb[3].mxu1 }
 0x571   :  { %v513_v0 = vsel %vm512_vm4, %v509_v7, -inf }
 0x572   :  { %514 = vmax.xlane.f32.xlu0 %v513_v0 }
 0x5ff   :  { %v515_v9 = vpop.xlane.xlu0 %514 }
 0x600   :  { %v516_v10 = vsub.f32 %v509_v7, %v515_v9 }
 0x602   :  { %v517_v11 = vmul.f32 1.442695, %v516_v10 }
 0x604   :  { %637 = vpow2.f32 %v517_v11 }
 0x60e   :  { %v638_v12 = vpop.eup %637 }
 0x60f   :  { %v519_v13 = vsel %vm512_vm4, %v638_v12, 0.0 }
 0x610   :  { %520 = vadd.xlane.f32.xlu1 %v519_v13 }
 0x69d   :  { %v521_v14 = vpop.xlane.xlu1 %520 }
 0x69e   :  { %639 = vrcp.f32 %v521_v14 }
 0x6a8   :  { %v640_v15 = vpop.eup %639 }
 0x6a9   :  { %v523_v16 = vmul.f32 %v640_v15, %v638_v12 }
 0x6ab   :  { %524 = vst.msk [vmem:[#allocation13] sm:$0xff] %vm512_vm4, %v523_v16 }
 0x6ac   :  { %784 = shalt.err (!%p781_p10)
}
 0x6ad   :  { %s785_s29 = scalar_lea.hbm %s992_s7, 128 }
 0x6ae   :  { %p786_p11 = scmp.ne.s32.totalorder %s992_s7, %s785_s29  ;;  %p789_p12 = scmp.lt.u32.totalorder %s785_s29, %s992_s7 }
 0x6b0   :  { %p791_p13 = pnand %p789_p12, %p786_p11 }
 0x6b2   :  { %794 = shalt.err (!%p791_p13)
}
 0x6b3   :  { %534 = dma.vmem_to_hbm [thread:$0]  %s532_s23, 128, %s992_s7, [#allocation4]  }
 0x6b4   :  { %803 = dma.done.wait [#allocation4], 128  }
 0x6b5   :  { %804 = vsyncadd [#allocation4], 4294967168 }
 0x6b6   :  { %538 = vsyncpa [#allocation3], 1 }
 0x6b7   :  { %539 = vsyncpa [#allocation6], 1 }
 0x6b8   :  { %540 = vsyncpa [#allocation9], 1 }
 0x6b9   :  { %541 = vsyncpa [#allocation12], 1 }
 0x6ba   :  { %542 = vsyncpa [#allocation4], 1 }

</bundles_post_ra>
